<compile_context>
chip_gen: v5e
topology: v5e:2x2
jax: 0.10.0
libtpu: 0.0.40
codegen_flags: <defaults>
</compile_context>

<pallas_src>
import functools

import jax
import jax.numpy as jnp
from jax.experimental import pallas as pl
from jax.experimental.pallas import tpu as pltpu


def _round_up(n, m):
    return ((n + m - 1) // m) * m


def _rnn_chunk_kernel(xw_ref, wh_ref, h0_ref, out_ref, h_scratch, *, t_chunk, threshold):
    """One grid step == `t_chunk` timesteps of the recurrence for one batch tile.

    xw_ref    : (b_tile, t_chunk, Hp)  precomputed x @ Wi^T + bi + bh
    wh_ref    : (Hp, Hp)               Wh^T + I   (residual folded in)
    h0_ref    : (1, Hp)                learned initial hidden state
    out_ref   : (b_tile, t_chunk, Hp)  thresholded hidden states
    h_scratch : (b_tile, Hp) f32       hidden state carried across time chunks
    """
    # Re-initialize the carry at the start of each batch tile's time loop.
    @pl.when(pl.program_id(1) == 0)
    def _():
        h_scratch[...] = jnp.broadcast_to(h0_ref[...], h_scratch.shape)

    wh = wh_ref[...]          # resident for the whole chunk
    h = h_scratch[...]

    # Fully unrolled serial recurrence (static trip count). Only one matmul, one add
    # and one clamp per step remain on the serial critical path.
    for t in range(t_chunk):
        pre = xw_ref[:, t, :] + jnp.dot(h, wh, preferred_element_type=jnp.float32)
        h = jnp.minimum(jnp.maximum(pre, 0.0), threshold)
        out_ref[:, t, :] = h

    h_scratch[...] = h


def thresholded_rnn_forward(x, wi_t, bi, wh_t, bh, hidden_init, threshold,
                            *, t_chunk=None, b_tile=None):
    """x: [B, T, In] (PyTorch convention). wi_t: [In, H], wh_t: [H, H] (pre-transposed
    weights). Returns (rnn_out [B, T, H], hidden [B, H])."""
    B, T, In = x.shape
    H = wh_t.shape[1]
    out_dtype = x.dtype
    f32 = jnp.float32

    # --- Hoisted, time-independent input projection; both biases folded in. -------
    xw = jnp.einsum("bti,ih->bth", x.astype(f32), wi_t.astype(f32),
                    preferred_element_type=f32) + (bi + bh).astype(f32)   # [B, T, H]

    # --- Fold the residual `h +` into the recurrent weight: Wh' = Wh^T + I. -------
    wh_eff = wh_t.astype(f32) + jnp.eye(H, dtype=f32)

    # --- Pad to vreg/MXU-friendly shapes: lanes (H) -> x128, sublanes (B) -> x8. ---
    Hp = _round_up(H, 128)
    Bp = _round_up(B, 8)
    if t_chunk is None:
        t_chunk = T if T <= 32 else 32            # multiple of 8 (or == full T axis)
    Tp = _round_up(T, t_chunk)
    if b_tile is None:
        b_tile = Bp if Bp <= 128 else (128 if Bp % 128 == 0 else Bp)

    xw_p = jnp.pad(xw, ((0, Bp - B), (0, Tp - T), (0, Hp - H)))
    wh_p = jnp.pad(wh_eff, ((0, Hp - H), (0, Hp - H)))
    h0_p = jnp.pad(hidden_init.reshape(1, H).astype(f32), ((0, 0), (0, Hp - H)))

    kernel = functools.partial(_rnn_chunk_kernel, t_chunk=t_chunk,
                               threshold=float(threshold))

    grid = (Bp // b_tile, Tp // t_chunk)

    out_p = pl.pallas_call(
        kernel,
        out_shape=jax.ShapeDtypeStruct((Bp, Tp, Hp), f32),
        grid_spec=pltpu.PrefetchScalarGridSpec(
            num_scalar_prefetch=0,
            grid=grid,
            in_specs=[
                pl.BlockSpec((b_tile, t_chunk, Hp), lambda b, c: (b, c, 0)),  # xw
                pl.BlockSpec((Hp, Hp), lambda b, c: (0, 0)),                  # Wh' (+I)
                pl.BlockSpec((1, Hp), lambda b, c: (0, 0)),                   # h0
            ],
            out_specs=pl.BlockSpec((b_tile, t_chunk, Hp), lambda b, c: (b, c, 0)),
            scratch_shapes=[pltpu.VMEM((b_tile, Hp), jnp.float32)],
        ),
        compiler_params=pltpu.CompilerParams(
            # batch tiles are independent -> parallel (v7x megacore);
            # the time recurrence must run sequentially -> arbitrary.
            dimension_semantics=("parallel", "arbitrary"),
        ),
    )(xw_p, wh_p, h0_p)

    rnn_out = out_p[:B, :T, :H].astype(out_dtype)
    h_last = rnn_out[:, -1, :]                    # == hidden after the last real step
    return rnn_out, h_last


def reference_forward(x, wi_t, bi, wh_t, bh, hidden_init, threshold):
    """Pure-JAX reference mirroring the PyTorch loop."""
    B = x.shape[0]
    h = jnp.broadcast_to(hidden_init.reshape(1, -1), (B, hidden_init.shape[-1]))
    outs = []
    for t in range(x.shape[1]):
        pre = h + x[:, t] @ wi_t + bi + h @ wh_t + bh
        h = jnp.minimum(jnp.maximum(pre, 0.0), threshold)
        outs.append(h)
    return jnp.stack(outs, axis=1), h


if __name__ == "__main__":
    B, T, INPUT, HIDDEN = 2, 8, 4, 32
    THRESHOLD = 0.5
    dtype = jnp.float32

    key = jax.random.PRNGKey(0)
    k_x, k_wi, k_bi, k_wh, k_bh = jax.random.split(key, 5)

    # Deterministic parameter init (nn.Linear-style U(-1/sqrt(fan_in), +)).
    bound_i = 1.0 / (INPUT ** 0.5)
    bound_h = 1.0 / (HIDDEN ** 0.5)
    wi = jax.random.uniform(k_wi, (HIDDEN, INPUT), dtype, -bound_i, bound_i)   # i2h.weight
    bi = jax.random.uniform(k_bi, (HIDDEN,), dtype, -bound_i, bound_i)         # i2h.bias
    wh = jax.random.uniform(k_wh, (HIDDEN, HIDDEN), dtype, -bound_h, bound_h)  # h2h.weight
    bh = jax.random.uniform(k_bh, (HIDDEN,), dtype, -bound_h, bound_h)         # h2h.bias
    hidden_init = jnp.zeros((1, HIDDEN), dtype)                                # as in __init__

    x = jax.random.normal(k_x, (B, T, INPUT), dtype)

    # Kernel takes pre-transposed weights (In, H) / (H, H) so matmuls are x @ W.
    rnn_out, h_last = thresholded_rnn_forward(
        x, wi.T, bi, wh.T, bh, hidden_init, THRESHOLD)
    rnn_out, h_last = jax.block_until_ready((rnn_out, h_last))

    ref_out, ref_h = reference_forward(x, wi.T, bi, wh.T, bh, hidden_init, THRESHOLD)
    assert rnn_out.shape == (B, T, HIDDEN) and h_last.shape == (B, HIDDEN)
    assert jnp.allclose(rnn_out, ref_out, atol=2e-5, rtol=2e-5)
    assert jnp.allclose(h_last, ref_h, atol=2e-5, rtol=2e-5)

    print("KERNEL_OK")
</pallas_src>

<mosaic_0001>
module attributes {stable_mosaic.version = 11 : i64} {
  func.func @_rnn_chunk_kernel(%arg0: i32, %arg1: i32, %arg2: memref<8x8x128xf32, #tpu.memory_space<vmem>>, %arg3: memref<128x128xf32, #tpu.memory_space<vmem>>, %arg4: memref<1x128xf32, #tpu.memory_space<vmem>>, %arg5: memref<8x8x128xf32, #tpu.memory_space<vmem>>, %arg6: memref<8x128xf32, #tpu.memory_space<vmem>>) attributes {dimension_semantics = [#tpu.dimension_semantics<parallel>, #tpu.dimension_semantics<arbitrary>], iteration_bounds = array<i64: 1, 1>, scalar_prefetch = 0 : i64, scratch_operands = 1 : i64, tpu.core_type = #tpu.core_type<tc>, window_params = [{transform_indices = @transform_0, window_bounds = array<i64: 8, 8, 128>}, {pipeline_mode = #tpu.pipeline_mode<synchronous>, transform_indices = @transform_1, window_bounds = array<i64: 128, 128>}, {pipeline_mode = #tpu.pipeline_mode<synchronous>, transform_indices = @transform_2, window_bounds = array<i64: 1, 128>}, {transform_indices = @transform_3, window_bounds = array<i64: 8, 8, 128>}]} {
    %c0_i32 = arith.constant 0 : i32
    %0 = arith.cmpi eq, %arg1, %c0_i32 : i32
    %1 = arith.extui %0 : i1 to i32
    %c0_i32_0 = arith.constant 0 : i32
    %2 = arith.cmpi ne, %1, %c0_i32_0 : i32
    scf.if %2 {
      %c0_70 = arith.constant 0 : index
      %c0_71 = arith.constant 0 : index
      %94 = vector.load %arg4[%c0_70, %c0_71] : memref<1x128xf32, #tpu.memory_space<vmem>>, vector<1x128xf32>
      %95 = vector.shape_cast %94 : vector<1x128xf32> to vector<1x128xf32>
      %96 = vector.broadcast %95 : vector<1x128xf32> to vector<8x128xf32>
      %c0_72 = arith.constant 0 : index
      %c0_73 = arith.constant 0 : index
      %97 = vector.load %arg6[%c0_72, %c0_73] : memref<8x128xf32, #tpu.memory_space<vmem>>, vector<8x128xf32>
      tpu.vector_store %arg6[%c0_72, %c0_73], %96 {strides = array<i32>} : memref<8x128xf32, #tpu.memory_space<vmem>>, vector<8x128xf32>,
    } else {
    }
    %c0 = arith.constant 0 : index
    %c0_1 = arith.constant 0 : index
    %3 = vector.load %arg3[%c0, %c0_1] : memref<128x128xf32, #tpu.memory_space<vmem>>, vector<128x128xf32>
    %c0_2 = arith.constant 0 : index
    %c0_3 = arith.constant 0 : index
    %4 = vector.load %arg6[%c0_2, %c0_3] : memref<8x128xf32, #tpu.memory_space<vmem>>, vector<8x128xf32>
    %c0_4 = arith.constant 0 : index
    %c0_5 = arith.constant 0 : index
    %c0_6 = arith.constant 0 : index
    %5 = vector.load %arg2[%c0_4, %c0_5, %c0_6] : memref<8x8x128xf32, #tpu.memory_space<vmem>>, vector<8x1x128xf32>
    %6 = vector.shape_cast %5 : vector<8x1x128xf32> to vector<8x128xf32>
    %cst = arith.constant dense<0.000000e+00> : vector<8x128xf32>
    %7 = tpu.matmul %4, %3, %cst {dimension_numbers = #tpu.dot_dimension_numbers<[1], [0], [0], [1], [0, 0, 1, 1], [], []>} : vector<8x128xf32>, vector<128x128xf32>, vector<8x128xf32> -> vector<8x128xf32>
    %8 = arith.addf %6, %7 : vector<8x128xf32>
    %cst_7 = arith.constant 0.000000e+00 : f32
    %9 = vector.broadcast %cst_7 : f32 to vector<8x128xf32>
    %10 = arith.maximumf %8, %9 : vector<8x128xf32>
    %cst_8 = arith.constant 5.000000e-01 : f32
    %11 = vector.broadcast %cst_8 : f32 to vector<8x128xf32>
    %12 = arith.minimumf %10, %11 : vector<8x128xf32>
    %c0_9 = arith.constant 0 : index
    %c0_10 = arith.constant 0 : index
    %c0_11 = arith.constant 0 : index
    %13 = vector.load %arg5[%c0_9, %c0_10, %c0_11] : memref<8x8x128xf32, #tpu.memory_space<vmem>>, vector<8x1x128xf32>
    %14 = vector.shape_cast %13 : vector<8x1x128xf32> to vector<8x128xf32>
    %15 = vector.shape_cast %12 : vector<8x128xf32> to vector<8x1x128xf32>
    tpu.vector_store %arg5[%c0_9, %c0_10, %c0_11], %15 {strides = array<i32>} : memref<8x8x128xf32, #tpu.memory_space<vmem>>, vector<8x1x128xf32>,
    %c0_12 = arith.constant 0 : index
    %c1 = arith.constant 1 : index
    %c0_13 = arith.constant 0 : index
    %16 = vector.load %arg2[%c0_12, %c1, %c0_13] : memref<8x8x128xf32, #tpu.memory_space<vmem>>, vector<8x1x128xf32>
    %17 = vector.shape_cast %16 : vector<8x1x128xf32> to vector<8x128xf32>
    %cst_14 = arith.constant dense<0.000000e+00> : vector<8x128xf32>
    %18 = tpu.matmul %12, %3, %cst_14 {dimension_numbers = #tpu.dot_dimension_numbers<[1], [0], [0], [1], [0, 0, 1, 1], [], []>} : vector<8x128xf32>, vector<128x128xf32>, vector<8x128xf32> -> vector<8x128xf32>
    %19 = arith.addf %17, %18 : vector<8x128xf32>
    %cst_15 = arith.constant 0.000000e+00 : f32
    %20 = vector.broadcast %cst_15 : f32 to vector<8x128xf32>
    %21 = arith.maximumf %19, %20 : vector<8x128xf32>
    %cst_16 = arith.constant 5.000000e-01 : f32
    %22 = vector.broadcast %cst_16 : f32 to vector<8x128xf32>
    %23 = arith.minimumf %21, %22 : vector<8x128xf32>
    %c0_17 = arith.constant 0 : index
    %c1_18 = arith.constant 1 : index
    %c0_19 = arith.constant 0 : index
    %24 = vector.load %arg5[%c0_17, %c1_18, %c0_19] : memref<8x8x128xf32, #tpu.memory_space<vmem>>, vector<8x1x128xf32>
    %25 = vector.shape_cast %24 : vector<8x1x128xf32> to vector<8x128xf32>
    %26 = vector.shape_cast %23 : vector<8x128xf32> to vector<8x1x128xf32>
    tpu.vector_store %arg5[%c0_17, %c1_18, %c0_19], %26 {strides = array<i32>} : memref<8x8x128xf32, #tpu.memory_space<vmem>>, vector<8x1x128xf32>,
    %c0_20 = arith.constant 0 : index
    %c2 = arith.constant 2 : index
    %c0_21 = arith.constant 0 : index
    %27 = vector.load %arg2[%c0_20, %c2, %c0_21] : memref<8x8x128xf32, #tpu.memory_space<vmem>>, vector<8x1x128xf32>
    %28 = vector.shape_cast %27 : vector<8x1x128xf32> to vector<8x128xf32>
    %cst_22 = arith.constant dense<0.000000e+00> : vector<8x128xf32>
    %29 = tpu.matmul %23, %3, %cst_22 {dimension_numbers = #tpu.dot_dimension_numbers<[1], [0], [0], [1], [0, 0, 1, 1], [], []>} : vector<8x128xf32>, vector<128x128xf32>, vector<8x128xf32> -> vector<8x128xf32>
    %30 = arith.addf %28, %29 : vector<8x128xf32>
    %cst_23 = arith.constant 0.000000e+00 : f32
    %31 = vector.broadcast %cst_23 : f32 to vector<8x128xf32>
    %32 = arith.maximumf %30, %31 : vector<8x128xf32>
    %cst_24 = arith.constant 5.000000e-01 : f32
    %33 = vector.broadcast %cst_24 : f32 to vector<8x128xf32>
    %34 = arith.minimumf %32, %33 : vector<8x128xf32>
    %c0_25 = arith.constant 0 : index
    %c2_26 = arith.constant 2 : index
    %c0_27 = arith.constant 0 : index
    %35 = vector.load %arg5[%c0_25, %c2_26, %c0_27] : memref<8x8x128xf32, #tpu.memory_space<vmem>>, vector<8x1x128xf32>
    %36 = vector.shape_cast %35 : vector<8x1x128xf32> to vector<8x128xf32>
    %37 = vector.shape_cast %34 : vector<8x128xf32> to vector<8x1x128xf32>
    tpu.vector_store %arg5[%c0_25, %c2_26, %c0_27], %37 {strides = array<i32>} : memref<8x8x128xf32, #tpu.memory_space<vmem>>, vector<8x1x128xf32>,
    %c0_28 = arith.constant 0 : index
    %c3 = arith.constant 3 : index
    %c0_29 = arith.constant 0 : index
    %38 = vector.load %arg2[%c0_28, %c3, %c0_29] : memref<8x8x128xf32, #tpu.memory_space<vmem>>, vector<8x1x128xf32>
    %39 = vector.shape_cast %38 : vector<8x1x128xf32> to vector<8x128xf32>
    %cst_30 = arith.constant dense<0.000000e+00> : vector<8x128xf32>
    %40 = tpu.matmul %34, %3, %cst_30 {dimension_numbers = #tpu.dot_dimension_numbers<[1], [0], [0], [1], [0, 0, 1, 1], [], []>} : vector<8x128xf32>, vector<128x128xf32>, vector<8x128xf32> -> vector<8x128xf32>
    %41 = arith.addf %39, %40 : vector<8x128xf32>
    %cst_31 = arith.constant 0.000000e+00 : f32
    %42 = vector.broadcast %cst_31 : f32 to vector<8x128xf32>
    %43 = arith.maximumf %41, %42 : vector<8x128xf32>
    %cst_32 = arith.constant 5.000000e-01 : f32
    %44 = vector.broadcast %cst_32 : f32 to vector<8x128xf32>
    %45 = arith.minimumf %43, %44 : vector<8x128xf32>
    %c0_33 = arith.constant 0 : index
    %c3_34 = arith.constant 3 : index
    %c0_35 = arith.constant 0 : index
    %46 = vector.load %arg5[%c0_33, %c3_34, %c0_35] : memref<8x8x128xf32, #tpu.memory_space<vmem>>, vector<8x1x128xf32>
    %47 = vector.shape_cast %46 : vector<8x1x128xf32> to vector<8x128xf32>
    %48 = vector.shape_cast %45 : vector<8x128xf32> to vector<8x1x128xf32>
    tpu.vector_store %arg5[%c0_33, %c3_34, %c0_35], %48 {strides = array<i32>} : memref<8x8x128xf32, #tpu.memory_space<vmem>>, vector<8x1x128xf32>,
    %c0_36 = arith.constant 0 : index
    %c4 = arith.constant 4 : index
    %c0_37 = arith.constant 0 : index
    %49 = vector.load %arg2[%c0_36, %c4, %c0_37] : memref<8x8x128xf32, #tpu.memory_space<vmem>>, vector<8x1x128xf32>
    %50 = vector.shape_cast %49 : vector<8x1x128xf32> to vector<8x128xf32>
    %cst_38 = arith.constant dense<0.000000e+00> : vector<8x128xf32>
    %51 = tpu.matmul %45, %3, %cst_38 {dimension_numbers = #tpu.dot_dimension_numbers<[1], [0], [0], [1], [0, 0, 1, 1], [], []>} : vector<8x128xf32>, vector<128x128xf32>, vector<8x128xf32> -> vector<8x128xf32>
    %52 = arith.addf %50, %51 : vector<8x128xf32>
    %cst_39 = arith.constant 0.000000e+00 : f32
    %53 = vector.broadcast %cst_39 : f32 to vector<8x128xf32>
    %54 = arith.maximumf %52, %53 : vector<8x128xf32>
    %cst_40 = arith.constant 5.000000e-01 : f32
    %55 = vector.broadcast %cst_40 : f32 to vector<8x128xf32>
    %56 = arith.minimumf %54, %55 : vector<8x128xf32>
    %c0_41 = arith.constant 0 : index
    %c4_42 = arith.constant 4 : index
    %c0_43 = arith.constant 0 : index
    %57 = vector.load %arg5[%c0_41, %c4_42, %c0_43] : memref<8x8x128xf32, #tpu.memory_space<vmem>>, vector<8x1x128xf32>
    %58 = vector.shape_cast %57 : vector<8x1x128xf32> to vector<8x128xf32>
    %59 = vector.shape_cast %56 : vector<8x128xf32> to vector<8x1x128xf32>
    tpu.vector_store %arg5[%c0_41, %c4_42, %c0_43], %59 {strides = array<i32>} : memref<8x8x128xf32, #tpu.memory_space<vmem>>, vector<8x1x128xf32>,
    %c0_44 = arith.constant 0 : index
    %c5 = arith.constant 5 : index
    %c0_45 = arith.constant 0 : index
    %60 = vector.load %arg2[%c0_44, %c5, %c0_45] : memref<8x8x128xf32, #tpu.memory_space<vmem>>, vector<8x1x128xf32>
    %61 = vector.shape_cast %60 : vector<8x1x128xf32> to vector<8x128xf32>
    %cst_46 = arith.constant dense<0.000000e+00> : vector<8x128xf32>
    %62 = tpu.matmul %56, %3, %cst_46 {dimension_numbers = #tpu.dot_dimension_numbers<[1], [0], [0], [1], [0, 0, 1, 1], [], []>} : vector<8x128xf32>, vector<128x128xf32>, vector<8x128xf32> -> vector<8x128xf32>
    %63 = arith.addf %61, %62 : vector<8x128xf32>
    %cst_47 = arith.constant 0.000000e+00 : f32
    %64 = vector.broadcast %cst_47 : f32 to vector<8x128xf32>
    %65 = arith.maximumf %63, %64 : vector<8x128xf32>
    %cst_48 = arith.constant 5.000000e-01 : f32
    %66 = vector.broadcast %cst_48 : f32 to vector<8x128xf32>
    %67 = arith.minimumf %65, %66 : vector<8x128xf32>
    %c0_49 = arith.constant 0 : index
    %c5_50 = arith.constant 5 : index
    %c0_51 = arith.constant 0 : index
    %68 = vector.load %arg5[%c0_49, %c5_50, %c0_51] : memref<8x8x128xf32, #tpu.memory_space<vmem>>, vector<8x1x128xf32>
    %69 = vector.shape_cast %68 : vector<8x1x128xf32> to vector<8x128xf32>
    %70 = vector.shape_cast %67 : vector<8x128xf32> to vector<8x1x128xf32>
    tpu.vector_store %arg5[%c0_49, %c5_50, %c0_51], %70 {strides = array<i32>} : memref<8x8x128xf32, #tpu.memory_space<vmem>>, vector<8x1x128xf32>,
    %c0_52 = arith.constant 0 : index
    %c6 = arith.constant 6 : index
    %c0_53 = arith.constant 0 : index
    %71 = vector.load %arg2[%c0_52, %c6, %c0_53] : memref<8x8x128xf32, #tpu.memory_space<vmem>>, vector<8x1x128xf32>
    %72 = vector.shape_cast %71 : vector<8x1x128xf32> to vector<8x128xf32>
    %cst_54 = arith.constant dense<0.000000e+00> : vector<8x128xf32>
    %73 = tpu.matmul %67, %3, %cst_54 {dimension_numbers = #tpu.dot_dimension_numbers<[1], [0], [0], [1], [0, 0, 1, 1], [], []>} : vector<8x128xf32>, vector<128x128xf32>, vector<8x128xf32> -> vector<8x128xf32>
    %74 = arith.addf %72, %73 : vector<8x128xf32>
    %cst_55 = arith.constant 0.000000e+00 : f32
    %75 = vector.broadcast %cst_55 : f32 to vector<8x128xf32>
    %76 = arith.maximumf %74, %75 : vector<8x128xf32>
    %cst_56 = arith.constant 5.000000e-01 : f32
    %77 = vector.broadcast %cst_56 : f32 to vector<8x128xf32>
    %78 = arith.minimumf %76, %77 : vector<8x128xf32>
    %c0_57 = arith.constant 0 : index
    %c6_58 = arith.constant 6 : index
    %c0_59 = arith.constant 0 : index
    %79 = vector.load %arg5[%c0_57, %c6_58, %c0_59] : memref<8x8x128xf32, #tpu.memory_space<vmem>>, vector<8x1x128xf32>
    %80 = vector.shape_cast %79 : vector<8x1x128xf32> to vector<8x128xf32>
    %81 = vector.shape_cast %78 : vector<8x128xf32> to vector<8x1x128xf32>
    tpu.vector_store %arg5[%c0_57, %c6_58, %c0_59], %81 {strides = array<i32>} : memref<8x8x128xf32, #tpu.memory_space<vmem>>, vector<8x1x128xf32>,
    %c0_60 = arith.constant 0 : index
    %c7 = arith.constant 7 : index
    %c0_61 = arith.constant 0 : index
    %82 = vector.load %arg2[%c0_60, %c7, %c0_61] : memref<8x8x128xf32, #tpu.memory_space<vmem>>, vector<8x1x128xf32>
    %83 = vector.shape_cast %82 : vector<8x1x128xf32> to vector<8x128xf32>
    %cst_62 = arith.constant dense<0.000000e+00> : vector<8x128xf32>
    %84 = tpu.matmul %78, %3, %cst_62 {dimension_numbers = #tpu.dot_dimension_numbers<[1], [0], [0], [1], [0, 0, 1, 1], [], []>} : vector<8x128xf32>, vector<128x128xf32>, vector<8x128xf32> -> vector<8x128xf32>
    %85 = arith.addf %83, %84 : vector<8x128xf32>
    %cst_63 = arith.constant 0.000000e+00 : f32
    %86 = vector.broadcast %cst_63 : f32 to vector<8x128xf32>
    %87 = arith.maximumf %85, %86 : vector<8x128xf32>
    %cst_64 = arith.constant 5.000000e-01 : f32
    %88 = vector.broadcast %cst_64 : f32 to vector<8x128xf32>
    %89 = arith.minimumf %87, %88 : vector<8x128xf32>
    %c0_65 = arith.constant 0 : index
    %c7_66 = arith.constant 7 : index
    %c0_67 = arith.constant 0 : index
    %90 = vector.load %arg5[%c0_65, %c7_66, %c0_67] : memref<8x8x128xf32, #tpu.memory_space<vmem>>, vector<8x1x128xf32>
    %91 = vector.shape_cast %90 : vector<8x1x128xf32> to vector<8x128xf32>
    %92 = vector.shape_cast %89 : vector<8x128xf32> to vector<8x1x128xf32>
    tpu.vector_store %arg5[%c0_65, %c7_66, %c0_67], %92 {strides = array<i32>} : memref<8x8x128xf32, #tpu.memory_space<vmem>>, vector<8x1x128xf32>,
    %c0_68 = arith.constant 0 : index
    %c0_69 = arith.constant 0 : index
    %93 = vector.load %arg6[%c0_68, %c0_69] : memref<8x128xf32, #tpu.memory_space<vmem>>, vector<8x128xf32>
    tpu.vector_store %arg6[%c0_68, %c0_69], %89 {strides = array<i32>} : memref<8x128xf32, #tpu.memory_space<vmem>>, vector<8x128xf32>,
    return
  }
  func.func @transform_0(%arg0: i32, %arg1: i32) -> (i32, i32, i32) {
    %c0_i32 = arith.constant 0 : i32
    %c0_i32_0 = arith.constant 0 : i32
    return %arg0, %arg1, %c0_i32 : i32, i32, i32
  }
  func.func @transform_1(%arg0: i32, %arg1: i32) -> (i32, i32) {
    %c0_i32 = arith.constant 0 : i32
    %c0_i32_0 = arith.constant 0 : i32
    %c0_i32_1 = arith.constant 0 : i32
    return %c0_i32, %c0_i32_0 : i32, i32
  }
  func.func @transform_2(%arg0: i32, %arg1: i32) -> (i32, i32) {
    %c0_i32 = arith.constant 0 : i32
    %c0_i32_0 = arith.constant 0 : i32
    %c0_i32_1 = arith.constant 0 : i32
    return %c0_i32, %c0_i32_0 : i32, i32
  }
  func.func @transform_3(%arg0: i32, %arg1: i32) -> (i32, i32, i32) {
    %c0_i32 = arith.constant 0 : i32
    %c0_i32_0 = arith.constant 0 : i32
    return %arg0, %arg1, %c0_i32 : i32, i32, i32
  }
}

</mosaic_0001>

<bundles_post_ra>
// kernel: tpu_custom_call.1
= control target key start
LH: loop header
LB: loop body
LE: loop exit
PB: predicated region body
PF: predicated region fallthrough
CT: control target
= control target key end

     0   :  { %8 = vsyncpa [#allocation4], 0  ;;  %s1232_s0 = inlined_call_operand.hbm [shape: f32[8,8,128], index: 0, kind: input, shape index: {}]   ;;  %s1233_s1 = inlined_call_operand.hbm [shape: f32[128,128], index: 1, kind: input, shape index: {}]   ;;  %s1234_s2 = inlined_call_operand.vmem [shape: f32[1,128], index: 2, kind: input, shape index: {}]   ;;  %s1235_s3 = inlined_call_operand.hbm [shape: f32[8,8,128], index: 3, kind: output, shape index: {}]  }
   0x1   :  { %9 = vsyncpa [#allocation7], 0 }
   0x2   :  { %10 = vsyncpa [#allocation5], 0  ;;  %s15_s14 = sshll.u32 %s1232_s0, 4  ;;  %s977_s15 = smov [#allocation3]   ;;  %s16_s14 = int_to_ptr.hbm [resolvable:$true] %s15_s14 }
   0x3   :  { %s17_s16 = sshll.u32 %s977_s15, 4  ;;  %s28_s19 = sshll.u32 %s1233_s1, 4  ;;  %s18_s16 = int_to_ptr.vmem [resolvable:$true] %s17_s16  ;;  %s29_s19 = int_to_ptr.hbm [resolvable:$true] %s28_s19 }
   0x4   :  { %s978_s20 = smov 128   ;;  %s979_s21 = smov 8  }
   0x5   :  { %23 = dma.hbm_to_vmem [thread:$0]  %s16_s14, 1024, %s18_s16, [#allocation4], %s978_s20, %s978_s20, %s979_s21  }
   0x6   :  { %s980_s22 = smov [#allocation6]  }
   0x7   :  { %s30_s23 = sshll.u32 %s980_s22, 4  ;;  %s31_s23 = int_to_ptr.vmem [resolvable:$true] %s30_s23 }
   0x8   :  { %36 = dma.hbm_to_vmem [thread:$0]  %s29_s19, 2048, %s31_s23, [#allocation7], %s978_s20, %s978_s20, %s979_s21  }
   0x9   :  { %971 = dma.done.wait [#allocation4], 1024  }
   0xa   :  { %972 = vsyncadd [#allocation4], 4294966272 }
   0xb   :  { %973 = dma.done.wait [#allocation7], 2048  }
   0xc   :  { %974 = vsyncadd [#allocation7], 4294965248  ;;  %v1014_v0 = vld [vmem:[#allocation6 + $0x78] sm:$0xff]  ;;  %v1016_v1 = vld [vmem:[#allocation6 + $0x70] sm:$0xff]  ;;  %vm166_vm0 = vcmask 1041409   ;;  %vm169_vm1 = vcmask 1042434  }
   0xd   :  { %81 = vmatpush.msra.mxu0 %v1014_v0  ;;  %187 = vmatpush.msra.mxu1 %v1014_v0  ;;  %v1020_v2 = vld [vmem:[#allocation6 + $0x68] sm:$0xff]  ;;  %v1026_v3 = vld [vmem:[#allocation6 + $0x60] sm:$0xff]  ;;  %v1032_v4 = vld [vmem:[#allocation6 + $0x58] sm:$0xff]  ;;  %vm172_vm2 = vcmask 1043459   ;;  %vm175_vm3 = vcmask 1044484   ;;  %vm178_vm4 = vcmask 1045509  }
   0xe   :  { %286 = vmatpush.msra.mxu2 %v1014_v0  ;;  %385 = vmatpush.msra.mxu3 %v1014_v0  ;;  %v1038_v5 = vld [vmem:[#allocation6 + $0x50] sm:$0xff]  ;;  %v1044_v6 = vld [vmem:[#allocation6 + $0x48] sm:$0xff]  ;;  %v1050_v7 = vld [vmem:[#allocation6 + $0x40] sm:$0xff]  ;;  %vm181_vm5 = vcmask 1046534   ;;  %vm184_vm6 = vcmask 1047559   ;;  %s879_s27 = sshll.u32 %s1235_s3, 4  ;;  %s880_s27 = int_to_ptr.hbm [resolvable:$true] %s879_s27 }
   0xf   :  { %82 = vmatpush.msra.mxu0 %v1016_v1  ;;  %188 = vmatpush.msra.mxu1 %v1016_v1  ;;  %v1056_v8 = vld [vmem:[#allocation6 + $0x38] sm:$0xff]  ;;  %v1062_v9 = vld [vmem:[#allocation6 + $0x30] sm:$0xff]  ;;  %v1068_v10 = vld [vmem:[#allocation6 + $0x28] sm:$0xff] }
  0x10   :  { %287 = vmatpush.msra.mxu2 %v1016_v1  ;;  %386 = vmatpush.msra.mxu3 %v1016_v1  ;;  %v1074_v11 = vld [vmem:[#allocation6 + $0x20] sm:$0xff]  ;;  %v1080_v12 = vld [vmem:[#allocation6 + $0x18] sm:$0xff]  ;;  %v1086_v13 = vld [vmem:[#allocation6 + $0x10] sm:$0xff] }
  0x11   :  { %83 = vmatpush.msra.mxu0 %v1020_v2  ;;  %189 = vmatpush.msra.mxu1 %v1020_v2  ;;  %v1092_v14 = vld [vmem:[#allocation6 + $0x8] sm:$0xff]  ;;  %v1098_v15 = vld [vmem:[#allocation6] sm:$0xff]  ;;  %v75_v19 = vld [vmem:[#allocation3 + $0x10] sm:$0x1] }
  0x12   :  { %288 = vmatpush.msra.mxu2 %v1020_v2  ;;  %387 = vmatpush.msra.mxu3 %v1020_v2  ;;  %v898_v16 = vld [vmem:[%s1234_s2] ss:$0 sm:$0xff]  ;;  %v74_v18 = vld [vmem:[#allocation3 + $0x8] sm:$0x1]  ;;  %v76_v20 = vld [vmem:[#allocation3 + $0x18] sm:$0x1] }
  0x13   :  { %84 = vmatpush.msra.mxu0 %v1026_v3  ;;  %190 = vmatpush.msra.mxu1 %v1026_v3  ;;  %v73_v17 = vld [vmem:[#allocation3] sm:$0x1]  ;;  %v78_v23 = vld [vmem:[#allocation3 + $0x28] sm:$0x1]  ;;  %v79_v24 = vld [vmem:[#allocation3 + $0x30] sm:$0x1] }
  0x14   :  { %289 = vmatpush.msra.mxu2 %v1026_v3  ;;  %388 = vmatpush.msra.mxu3 %v1026_v3  ;;  %v77_v22 = vld [vmem:[#allocation3 + $0x20] sm:$0x1]  ;;  %v80_v27 = vld [vmem:[#allocation3 + $0x38] sm:$0x1]  ;;  %s981_s2 = smov [#allocation8]  }
  0x15   :  { %85 = vmatpush.msra.mxu0 %v1032_v4  ;;  %191 = vmatpush.msra.mxu1 %v1032_v4  ;;  %s877_s24 = sshll.u32 %s981_s2, 4  ;;  %s878_s24 = int_to_ptr.vmem [resolvable:$true] %s877_s24 }
  0x16   :  { %290 = vmatpush.msra.mxu2 %v1032_v4  ;;  %389 = vmatpush.msra.mxu3 %v1032_v4 }
  0x17   :  { %86 = vmatpush.msra.mxu0 %v1038_v5  ;;  %192 = vmatpush.msra.mxu1 %v1038_v5 }
  0x18   :  { %291 = vmatpush.msra.mxu2 %v1038_v5  ;;  %390 = vmatpush.msra.mxu3 %v1038_v5 }
  0x19   :  { %87 = vmatpush.msra.mxu0 %v1044_v6  ;;  %193 = vmatpush.msra.mxu1 %v1044_v6 }
  0x1a   :  { %292 = vmatpush.msra.mxu2 %v1044_v6  ;;  %391 = vmatpush.msra.mxu3 %v1044_v6 }
  0x1b   :  { %88 = vmatpush.msra.mxu0 %v1050_v7  ;;  %194 = vmatpush.msra.mxu1 %v1050_v7 }
  0x1c   :  { %293 = vmatpush.msra.mxu2 %v1050_v7  ;;  %392 = vmatpush.msra.mxu3 %v1050_v7 }
  0x1d   :  { %89 = vmatpush.msra.mxu0 %v1056_v8  ;;  %195 = vmatpush.msra.mxu1 %v1056_v8 }
  0x1e   :  { %294 = vmatpush.msra.mxu2 %v1056_v8  ;;  %393 = vmatpush.msra.mxu3 %v1056_v8 }
  0x1f   :  { %90 = vmatpush.msra.mxu0 %v1062_v9  ;;  %196 = vmatpush.msra.mxu1 %v1062_v9 }
  0x20   :  { %295 = vmatpush.msra.mxu2 %v1062_v9  ;;  %394 = vmatpush.msra.mxu3 %v1062_v9 }
  0x21   :  { %91 = vmatpush.msra.mxu0 %v1068_v10  ;;  %197 = vmatpush.msra.mxu1 %v1068_v10 }
  0x22   :  { %296 = vmatpush.msra.mxu2 %v1068_v10  ;;  %395 = vmatpush.msra.mxu3 %v1068_v10 }
  0x23   :  { %92 = vmatpush.msra.mxu0 %v1074_v11  ;;  %198 = vmatpush.msra.mxu1 %v1074_v11 }
  0x24   :  { %297 = vmatpush.msra.mxu2 %v1074_v11  ;;  %396 = vmatpush.msra.mxu3 %v1074_v11 }
  0x25   :  { %93 = vmatpush.msra.mxu0 %v1080_v12  ;;  %199 = vmatpush.msra.mxu1 %v1080_v12 }
  0x26   :  { %298 = vmatpush.msra.mxu2 %v1080_v12  ;;  %397 = vmatpush.msra.mxu3 %v1080_v12 }
  0x27   :  { %94 = vmatpush.msra.mxu0 %v1086_v13  ;;  %200 = vmatpush.msra.mxu1 %v1086_v13 }
  0x28   :  { %299 = vmatpush.msra.mxu2 %v1086_v13  ;;  %398 = vmatpush.msra.mxu3 %v1086_v13 }
  0x29   :  { %95 = vmatpush.msra.mxu0 %v1092_v14  ;;  %201 = vmatpush.msra.mxu1 %v1092_v14 }
  0x2a   :  { %300 = vmatpush.msra.mxu2 %v1092_v14  ;;  %399 = vmatpush.msra.mxu3 %v1092_v14 }
  0x2b   :  { %96 = vmatpush.msra.mxu0 %v1098_v15  ;;  %202 = vmatpush.msra.mxu1 %v1098_v15 }
  0x2c   :  { %97 = vmatmul.f32.vlgmr.msra.gmra.mxu0 %v898_v16  ;;  %301 = vmatpush.msra.mxu2 %v1098_v15 }
  0x2d   :  { %400 = vmatpush.msra.mxu3 %v1098_v15  ;;  %484 = vmatpush.msrb.mxu0 %v1014_v0 }
  0x2e   :  { %583 = vmatpush.msrb.mxu1 %v1014_v0  ;;  %682 = vmatpush.msrb.mxu2 %v1014_v0 }
  0x2f   :  { %485 = vmatpush.msrb.mxu0 %v1016_v1  ;;  %781 = vmatpush.msrb.mxu3 %v1014_v0 }
  0x30   :  { %584 = vmatpush.msrb.mxu1 %v1016_v1  ;;  %683 = vmatpush.msrb.mxu2 %v1016_v1 }
  0x31   :  { %486 = vmatpush.msrb.mxu0 %v1020_v2  ;;  %782 = vmatpush.msrb.mxu3 %v1016_v1 }
  0x32   :  { %585 = vmatpush.msrb.mxu1 %v1020_v2  ;;  %684 = vmatpush.msrb.mxu2 %v1020_v2 }
  0x33   :  { %487 = vmatpush.msrb.mxu0 %v1026_v3  ;;  %783 = vmatpush.msrb.mxu3 %v1020_v2 }
  0x34   :  { %586 = vmatpush.msrb.mxu1 %v1026_v3  ;;  %685 = vmatpush.msrb.mxu2 %v1026_v3 }
  0x35   :  { %488 = vmatpush.msrb.mxu0 %v1032_v4  ;;  %784 = vmatpush.msrb.mxu3 %v1026_v3 }
  0x36   :  { %587 = vmatpush.msrb.mxu1 %v1032_v4  ;;  %686 = vmatpush.msrb.mxu2 %v1032_v4 }
  0x37   :  { %489 = vmatpush.msrb.mxu0 %v1038_v5  ;;  %785 = vmatpush.msrb.mxu3 %v1032_v4 }
  0x38   :  { %588 = vmatpush.msrb.mxu1 %v1038_v5  ;;  %687 = vmatpush.msrb.mxu2 %v1038_v5 }
  0x39   :  { %490 = vmatpush.msrb.mxu0 %v1044_v6  ;;  %786 = vmatpush.msrb.mxu3 %v1038_v5 }
  0x3a   :  { %589 = vmatpush.msrb.mxu1 %v1044_v6  ;;  %688 = vmatpush.msrb.mxu2 %v1044_v6 }
  0x3b   :  { %491 = vmatpush.msrb.mxu0 %v1050_v7  ;;  %787 = vmatpush.msrb.mxu3 %v1044_v6 }
  0x3c   :  { %590 = vmatpush.msrb.mxu1 %v1050_v7  ;;  %689 = vmatpush.msrb.mxu2 %v1050_v7 }
  0x3d   :  { %492 = vmatpush.msrb.mxu0 %v1056_v8  ;;  %788 = vmatpush.msrb.mxu3 %v1050_v7  ;;  %v149_v7 = vld [vmem:[#allocation3 + $0x1] sm:$0x1] }
  0x3e   :  { %591 = vmatpush.msrb.mxu1 %v1056_v8  ;;  %690 = vmatpush.msrb.mxu2 %v1056_v8 }
  0x3f   :  { %493 = vmatpush.msrb.mxu0 %v1062_v9  ;;  %789 = vmatpush.msrb.mxu3 %v1056_v8  ;;  %v150_v8 = vld [vmem:[#allocation3 + $0x9] sm:$0x1] }
  0x40   :  { %592 = vmatpush.msrb.mxu1 %v1062_v9  ;;  %691 = vmatpush.msrb.mxu2 %v1062_v9 }
  0x41   :  { %494 = vmatpush.msrb.mxu0 %v1068_v10  ;;  %790 = vmatpush.msrb.mxu3 %v1062_v9  ;;  %v151_v9 = vld [vmem:[#allocation3 + $0x11] sm:$0x1] }
  0x42   :  { %593 = vmatpush.msrb.mxu1 %v1068_v10  ;;  %692 = vmatpush.msrb.mxu2 %v1068_v10 }
  0x43   :  { %495 = vmatpush.msrb.mxu0 %v1074_v11  ;;  %791 = vmatpush.msrb.mxu3 %v1068_v10  ;;  %v152_v10 = vld [vmem:[#allocation3 + $0x19] sm:$0x1] }
  0x44   :  { %594 = vmatpush.msrb.mxu1 %v1074_v11  ;;  %693 = vmatpush.msrb.mxu2 %v1074_v11 }
  0x45   :  { %496 = vmatpush.msrb.mxu0 %v1080_v12  ;;  %792 = vmatpush.msrb.mxu3 %v1074_v11 }
  0x46   :  { %595 = vmatpush.msrb.mxu1 %v1080_v12  ;;  %694 = vmatpush.msrb.mxu2 %v1080_v12 }
  0x47   :  { %497 = vmatpush.msrb.mxu0 %v1086_v13  ;;  %793 = vmatpush.msrb.mxu3 %v1080_v12  ;;  %v153_v12 = vld [vmem:[#allocation3 + $0x21] sm:$0x1] }
  0x48   :  { %596 = vmatpush.msrb.mxu1 %v1086_v13  ;;  %695 = vmatpush.msrb.mxu2 %v1086_v13 }
  0x49   :  { %498 = vmatpush.msrb.mxu0 %v1092_v14  ;;  %794 = vmatpush.msrb.mxu3 %v1086_v13  ;;  %v154_v13 = vld [vmem:[#allocation3 + $0x29] sm:$0x1] }
  0x4a   :  { %597 = vmatpush.msrb.mxu1 %v1092_v14  ;;  %696 = vmatpush.msrb.mxu2 %v1092_v14 }
  0x4b   :  { %499 = vmatpush.msrb.mxu0 %v1098_v15  ;;  %795 = vmatpush.msrb.mxu3 %v1092_v14  ;;  %v155_v14 = vld [vmem:[#allocation3 + $0x31] sm:$0x1] }
  0x4c   :  { %598 = vmatpush.msrb.mxu1 %v1098_v15  ;;  %697 = vmatpush.msrb.mxu2 %v1098_v15 }
  0x4d   :  { %796 = vmatpush.msrb.mxu3 %v1098_v15 }
  0xa9   :  { %v98_v21 = vpop.f32.mrf.mxu0 }
  0xaa   :  { %v102_v25 = vrot.slane %v98_v21, 1  ;;  %v103_v26 = vrot.slane %v98_v21, 2  ;;  %v104_v28 = vrot.slane %v98_v21, 3  ;;  %v105_v29 = vrot.slane %v98_v21, 4 }
  0xab   :  { %v106_v30 = vrot.slane %v98_v21, 5  ;;  %v107_v31 = vrot.slane %v98_v21, 6  ;;  %v108_v32 = vrot.slane %v98_v21, 7  ;;  %v117_v33 = vadd.f32 %v98_v21, %v73_v17  ;;  %v156_v17 = vld [vmem:[#allocation3 + $0x39] sm:$0x1] }
  0xac   :  { %v118_v34 = vadd.f32 %v102_v25, %v74_v18  ;;  %v119_v35 = vadd.f32 %v103_v26, %v75_v19  ;;  %v120_v36 = vadd.f32 %v104_v28, %v76_v20  ;;  %v121_v37 = vadd.f32 %v105_v29, %v77_v22 }
  0xad   :  { %v122_v38 = vadd.f32 %v106_v30, %v78_v23  ;;  %v123_v39 = vadd.f32 %v107_v31, %v79_v24  ;;  %v124_v40 = vadd.f32 %v108_v32, %v80_v27  ;;  %v125_v41 = vmax.f32 %v117_v33, 0.0 }
  0xae   :  { %v126_v42 = vmax.f32 %v118_v34, 0.0  ;;  %v127_v43 = vmax.f32 %v119_v35, 0.0  ;;  %v128_v44 = vmax.f32 %v120_v36, 0.0  ;;  %v129_v45 = vmax.f32 %v121_v37, 0.0 }
  0xaf   :  { %v130_v46 = vmax.f32 %v122_v38, 0.0  ;;  %v131_v47 = vmax.f32 %v123_v39, 0.0  ;;  %v133_v48 = vmin.f32 %v125_v41, 0.5  ;;  %v132_v49 = vmax.f32 %v124_v40, 0.0 }
  0xb0   :  { %v134_v50 = vmin.f32 %v126_v42, 0.5  ;;  %v135_v51 = vmin.f32 %v127_v43, 0.5  ;;  %v136_v52 = vmin.f32 %v128_v44, 0.5  ;;  %v137_v53 = vmin.f32 %v129_v45, 0.5 }
  0xb1   :  { %141 = vst [vmem:[#allocation8] sm:$0x1] %v133_v48  ;;  %v138_v54 = vmin.f32 %v130_v46, 0.5  ;;  %v139_v57 = vmin.f32 %v131_v47, 0.5  ;;  %v140_v58 = vmin.f32 %v132_v49, 0.5 }
  0xb2   :  { %142 = vst [vmem:[#allocation8 + $0x8] sm:$0x1] %v134_v50  ;;  %v165_v55 = vrot.slane %v134_v50, 7  ;;  %v168_v56 = vrot.slane %v135_v51, 6  ;;  %v171_v60 = vrot.slane %v136_v52, 5  ;;  %v174_v62 = vrot.slane %v137_v53, 4 }
  0xb3   :  { %143 = vst [vmem:[#allocation8 + $0x10] sm:$0x1] %v135_v51  ;;  %v177_v0 = vrot.slane %v138_v54, 3  ;;  %v180_v2 = vrot.slane %v139_v57, 2  ;;  %v183_v4 = vrot.slane %v140_v58, 1 }
  0xb4   :  { %144 = vst [vmem:[#allocation8 + $0x18] sm:$0x1] %v136_v52  ;;  %v167_v59 = vsel %vm166_vm0, %v165_v55, %v133_v48 }
  0xb5   :  { %145 = vst [vmem:[#allocation8 + $0x20] sm:$0x1] %v137_v53  ;;  %v170_v61 = vsel %vm169_vm1, %v168_v56, %v167_v59 }
  0xb6   :  { %146 = vst [vmem:[#allocation8 + $0x28] sm:$0x1] %v138_v54  ;;  %v173_v63 = vsel %vm172_vm2, %v171_v60, %v170_v61  ;;  %v255_v61 = vld [vmem:[#allocation3 + $0x2] sm:$0x1] }
  0xb7   :  { %147 = vst [vmem:[#allocation8 + $0x30] sm:$0x1] %v139_v57  ;;  %v176_v1 = vsel %vm175_vm3, %v174_v62, %v173_v63  ;;  %v256_v62 = vld [vmem:[#allocation3 + $0xa] sm:$0x1]  ;;  %v257_v63 = vld [vmem:[#allocation3 + $0x12] sm:$0x1] }
  0xb8   :  { %148 = vst [vmem:[#allocation8 + $0x38] sm:$0x1] %v140_v58  ;;  %v179_v3 = vsel %vm178_vm4, %v177_v0, %v176_v1  ;;  %v258_v0 = vld [vmem:[#allocation3 + $0x1a] sm:$0x1] }
  0xb9   :  { %v182_v5 = vsel %vm181_vm5, %v180_v2, %v179_v3  ;;  %v259_v2 = vld [vmem:[#allocation3 + $0x22] sm:$0x1]  ;;  %v260_v3 = vld [vmem:[#allocation3 + $0x2a] sm:$0x1] }
  0xba   :  { %v185_v6 = vsel %vm184_vm6, %v183_v4, %v182_v5  ;;  %v261_v4 = vld [vmem:[#allocation3 + $0x32] sm:$0x1] }
  0xbb   :  { %203 = vmatmul.f32.vlgmr.msra.gmra.mxu1 %v185_v6 }
 0x138   :  { %v204_v11 = vpop.f32.mrf.mxu1 }
 0x139   :  { %v208_v15 = vrot.slane %v204_v11, 1  ;;  %v209_v16 = vrot.slane %v204_v11, 2  ;;  %v210_v18 = vrot.slane %v204_v11, 3  ;;  %v211_v19 = vrot.slane %v204_v11, 4 }
 0x13a   :  { %v212_v20 = vrot.slane %v204_v11, 5  ;;  %v213_v21 = vrot.slane %v204_v11, 6  ;;  %v214_v22 = vrot.slane %v204_v11, 7  ;;  %v223_v23 = vadd.f32 %v204_v11, %v149_v7  ;;  %v262_v7 = vld [vmem:[#allocation3 + $0x3a] sm:$0x1] }
 0x13b   :  { %v224_v24 = vadd.f32 %v208_v15, %v150_v8  ;;  %v225_v25 = vadd.f32 %v209_v16, %v151_v9  ;;  %v226_v26 = vadd.f32 %v210_v18, %v152_v10  ;;  %v227_v27 = vadd.f32 %v211_v19, %v153_v12 }
 0x13c   :  { %v228_v28 = vadd.f32 %v212_v20, %v154_v13  ;;  %v229_v29 = vadd.f32 %v213_v21, %v155_v14  ;;  %v230_v30 = vadd.f32 %v214_v22, %v156_v17  ;;  %v231_v31 = vmax.f32 %v223_v23, 0.0 }
 0x13d   :  { %v232_v32 = vmax.f32 %v224_v24, 0.0  ;;  %v233_v33 = vmax.f32 %v225_v25, 0.0  ;;  %v234_v34 = vmax.f32 %v226_v26, 0.0  ;;  %v235_v35 = vmax.f32 %v227_v27, 0.0 }
 0x13e   :  { %v236_v36 = vmax.f32 %v228_v28, 0.0  ;;  %v237_v37 = vmax.f32 %v229_v29, 0.0  ;;  %v239_v38 = vmin.f32 %v231_v31, 0.5  ;;  %v238_v39 = vmax.f32 %v230_v30, 0.0 }
 0x13f   :  { %v240_v40 = vmin.f32 %v232_v32, 0.5  ;;  %v241_v41 = vmin.f32 %v233_v33, 0.5  ;;  %v242_v42 = vmin.f32 %v234_v34, 0.5  ;;  %v243_v43 = vmin.f32 %v235_v35, 0.5 }
 0x140   :  { %247 = vst [vmem:[#allocation8 + $0x1] sm:$0x1] %v239_v38  ;;  %v244_v44 = vmin.f32 %v236_v36, 0.5  ;;  %v245_v47 = vmin.f32 %v237_v37, 0.5  ;;  %v246_v48 = vmin.f32 %v238_v39, 0.5 }
 0x141   :  { %248 = vst [vmem:[#allocation8 + $0x9] sm:$0x1] %v240_v40  ;;  %v271_v45 = vrot.slane %v240_v40, 7  ;;  %v273_v46 = vrot.slane %v241_v41, 6  ;;  %v275_v50 = vrot.slane %v242_v42, 5  ;;  %v277_v52 = vrot.slane %v243_v43, 4 }
 0x142   :  { %249 = vst [vmem:[#allocation8 + $0x11] sm:$0x1] %v241_v41  ;;  %v279_v54 = vrot.slane %v244_v44, 3  ;;  %v281_v56 = vrot.slane %v245_v47, 2  ;;  %v283_v58 = vrot.slane %v246_v48, 1 }
 0x143   :  { %250 = vst [vmem:[#allocation8 + $0x19] sm:$0x1] %v242_v42  ;;  %v272_v49 = vsel %vm166_vm0, %v271_v45, %v239_v38 }
 0x144   :  { %251 = vst [vmem:[#allocation8 + $0x21] sm:$0x1] %v243_v43  ;;  %v274_v51 = vsel %vm169_vm1, %v273_v46, %v272_v49 }
 0x145   :  { %252 = vst [vmem:[#allocation8 + $0x29] sm:$0x1] %v244_v44  ;;  %v276_v53 = vsel %vm172_vm2, %v275_v50, %v274_v51  ;;  %v354_v51 = vld [vmem:[#allocation3 + $0x3] sm:$0x1] }
 0x146   :  { %253 = vst [vmem:[#allocation8 + $0x31] sm:$0x1] %v245_v47  ;;  %v278_v55 = vsel %vm175_vm3, %v277_v52, %v276_v53  ;;  %v355_v52 = vld [vmem:[#allocation3 + $0xb] sm:$0x1]  ;;  %v356_v53 = vld [vmem:[#allocation3 + $0x13] sm:$0x1] }
 0x147   :  { %254 = vst [vmem:[#allocation8 + $0x39] sm:$0x1] %v246_v48  ;;  %v280_v57 = vsel %vm178_vm4, %v279_v54, %v278_v55  ;;  %v357_v54 = vld [vmem:[#allocation3 + $0x1b] sm:$0x1] }
 0x148   :  { %v282_v59 = vsel %vm181_vm5, %v281_v56, %v280_v57  ;;  %v358_v56 = vld [vmem:[#allocation3 + $0x23] sm:$0x1]  ;;  %v359_v57 = vld [vmem:[#allocation3 + $0x2b] sm:$0x1] }
 0x149   :  { %v284_v60 = vsel %vm184_vm6, %v283_v58, %v282_v59  ;;  %v360_v58 = vld [vmem:[#allocation3 + $0x33] sm:$0x1] }
 0x14a   :  { %302 = vmatmul.f32.vlgmr.msra.gmra.mxu2 %v284_v60 }
 0x1cd   :  { %v303_v1 = vpop.f32.mrf.mxu2 }
 0x1ce   :  { %v307_v5 = vrot.slane %v303_v1, 1  ;;  %v308_v6 = vrot.slane %v303_v1, 2  ;;  %v309_v8 = vrot.slane %v303_v1, 3  ;;  %v310_v9 = vrot.slane %v303_v1, 4 }
 0x1cf   :  { %v311_v10 = vrot.slane %v303_v1, 5  ;;  %v312_v11 = vrot.slane %v303_v1, 6  ;;  %v313_v12 = vrot.slane %v303_v1, 7  ;;  %v322_v13 = vadd.f32 %v303_v1, %v255_v61 }
 0x1d0   :  { %v323_v14 = vadd.f32 %v307_v5, %v256_v62  ;;  %v324_v15 = vadd.f32 %v308_v6, %v257_v63  ;;  %v325_v16 = vadd.f32 %v309_v8, %v258_v0  ;;  %v326_v17 = vadd.f32 %v310_v9, %v259_v2  ;;  %v361_v63 = vld [vmem:[#allocation3 + $0x3b] sm:$0x1] }
 0x1d1   :  { %v327_v18 = vadd.f32 %v311_v10, %v260_v3  ;;  %v328_v19 = vadd.f32 %v312_v11, %v261_v4  ;;  %v329_v20 = vadd.f32 %v313_v12, %v262_v7  ;;  %v330_v21 = vmax.f32 %v322_v13, 0.0 }
 0x1d2   :  { %v331_v22 = vmax.f32 %v323_v14, 0.0  ;;  %v332_v23 = vmax.f32 %v324_v15, 0.0  ;;  %v333_v24 = vmax.f32 %v325_v16, 0.0  ;;  %v334_v25 = vmax.f32 %v326_v17, 0.0 }
 0x1d3   :  { %v335_v26 = vmax.f32 %v327_v18, 0.0  ;;  %v336_v27 = vmax.f32 %v328_v19, 0.0  ;;  %v338_v28 = vmin.f32 %v330_v21, 0.5  ;;  %v337_v29 = vmax.f32 %v329_v20, 0.0 }
 0x1d4   :  { %v339_v30 = vmin.f32 %v331_v22, 0.5  ;;  %v340_v31 = vmin.f32 %v332_v23, 0.5  ;;  %v341_v32 = vmin.f32 %v333_v24, 0.5  ;;  %v342_v33 = vmin.f32 %v334_v25, 0.5 }
 0x1d5   :  { %346 = vst [vmem:[#allocation8 + $0x2] sm:$0x1] %v338_v28  ;;  %v343_v34 = vmin.f32 %v335_v26, 0.5  ;;  %v344_v37 = vmin.f32 %v336_v27, 0.5  ;;  %v345_v38 = vmin.f32 %v337_v29, 0.5 }
 0x1d6   :  { %347 = vst [vmem:[#allocation8 + $0xa] sm:$0x1] %v339_v30  ;;  %v370_v35 = vrot.slane %v339_v30, 7  ;;  %v372_v36 = vrot.slane %v340_v31, 6  ;;  %v374_v40 = vrot.slane %v341_v32, 5  ;;  %v376_v42 = vrot.slane %v342_v33, 4 }
 0x1d7   :  { %348 = vst [vmem:[#allocation8 + $0x12] sm:$0x1] %v340_v31  ;;  %v378_v44 = vrot.slane %v343_v34, 3  ;;  %v380_v46 = vrot.slane %v344_v37, 2  ;;  %v382_v48 = vrot.slane %v345_v38, 1 }
 0x1d8   :  { %349 = vst [vmem:[#allocation8 + $0x1a] sm:$0x1] %v341_v32  ;;  %v371_v39 = vsel %vm166_vm0, %v370_v35, %v338_v28 }
 0x1d9   :  { %350 = vst [vmem:[#allocation8 + $0x22] sm:$0x1] %v342_v33  ;;  %v373_v41 = vsel %vm169_vm1, %v372_v36, %v371_v39 }
 0x1da   :  { %351 = vst [vmem:[#allocation8 + $0x2a] sm:$0x1] %v343_v34  ;;  %v375_v43 = vsel %vm172_vm2, %v374_v40, %v373_v41  ;;  %v453_v41 = vld [vmem:[#allocation3 + $0x4] sm:$0x1] }
 0x1db   :  { %352 = vst [vmem:[#allocation8 + $0x32] sm:$0x1] %v344_v37  ;;  %v377_v45 = vsel %vm175_vm3, %v376_v42, %v375_v43  ;;  %v454_v42 = vld [vmem:[#allocation3 + $0xc] sm:$0x1]  ;;  %v455_v43 = vld [vmem:[#allocation3 + $0x14] sm:$0x1] }
 0x1dc   :  { %353 = vst [vmem:[#allocation8 + $0x3a] sm:$0x1] %v345_v38  ;;  %v379_v47 = vsel %vm178_vm4, %v378_v44, %v377_v45  ;;  %v456_v44 = vld [vmem:[#allocation3 + $0x1c] sm:$0x1] }
 0x1dd   :  { %v381_v49 = vsel %vm181_vm5, %v380_v46, %v379_v47  ;;  %v457_v46 = vld [vmem:[#allocation3 + $0x24] sm:$0x1]  ;;  %v458_v47 = vld [vmem:[#allocation3 + $0x2c] sm:$0x1] }
 0x1de   :  { %v383_v50 = vsel %vm184_vm6, %v382_v48, %v381_v49  ;;  %v459_v48 = vld [vmem:[#allocation3 + $0x34] sm:$0x1] }
 0x1df   :  { %401 = vmatmul.f32.vlgmr.msra.gmra.mxu3 %v383_v50 }
 0x262   :  { %v402_v55 = vpop.f32.mrf.mxu3 }
 0x263   :  { %v406_v59 = vrot.slane %v402_v55, 1  ;;  %v407_v60 = vrot.slane %v402_v55, 2  ;;  %v408_v61 = vrot.slane %v402_v55, 3  ;;  %v421_v62 = vadd.f32 %v402_v55, %v354_v51 }
 0x264   :  { %v409_v0 = vrot.slane %v402_v55, 4  ;;  %v410_v1 = vrot.slane %v402_v55, 5  ;;  %v411_v2 = vrot.slane %v402_v55, 6  ;;  %v412_v3 = vrot.slane %v402_v55, 7 }
 0x265   :  { %v422_v4 = vadd.f32 %v406_v59, %v355_v52  ;;  %v423_v5 = vadd.f32 %v407_v60, %v356_v53  ;;  %v424_v6 = vadd.f32 %v408_v61, %v357_v54  ;;  %v429_v7 = vmax.f32 %v421_v62, 0.0  ;;  %v460_v53 = vld [vmem:[#allocation3 + $0x3c] sm:$0x1] }
 0x266   :  { %v425_v8 = vadd.f32 %v409_v0, %v358_v56  ;;  %v426_v9 = vadd.f32 %v410_v1, %v359_v57  ;;  %v427_v10 = vadd.f32 %v411_v2, %v360_v58  ;;  %v428_v11 = vadd.f32 %v412_v3, %v361_v63 }
 0x267   :  { %v430_v12 = vmax.f32 %v422_v4, 0.0  ;;  %v431_v13 = vmax.f32 %v423_v5, 0.0  ;;  %v432_v14 = vmax.f32 %v424_v6, 0.0  ;;  %v437_v15 = vmin.f32 %v429_v7, 0.5 }
 0x268   :  { %v433_v16 = vmax.f32 %v425_v8, 0.0  ;;  %v434_v17 = vmax.f32 %v426_v9, 0.0  ;;  %v435_v18 = vmax.f32 %v427_v10, 0.0  ;;  %v436_v19 = vmax.f32 %v428_v11, 0.0 }
 0x269   :  { %v438_v20 = vmin.f32 %v430_v12, 0.5  ;;  %v439_v21 = vmin.f32 %v431_v13, 0.5  ;;  %v440_v22 = vmin.f32 %v432_v14, 0.5  ;;  %445 = vst [vmem:[#allocation8 + $0x3] sm:$0x1] %v437_v15 }
 0x26a   :  { %v441_v23 = vmin.f32 %v433_v16, 0.5  ;;  %v442_v24 = vmin.f32 %v434_v17, 0.5  ;;  %v443_v27 = vmin.f32 %v435_v18, 0.5  ;;  %v444_v28 = vmin.f32 %v436_v19, 0.5 }
 0x26b   :  { %446 = vst [vmem:[#allocation8 + $0xb] sm:$0x1] %v438_v20  ;;  %v469_v25 = vrot.slane %v438_v20, 7  ;;  %v471_v26 = vrot.slane %v439_v21, 6  ;;  %v473_v30 = vrot.slane %v440_v22, 5 }
 0x26c   :  { %447 = vst [vmem:[#allocation8 + $0x13] sm:$0x1] %v439_v21  ;;  %v475_v32 = vrot.slane %v441_v23, 4  ;;  %v477_v34 = vrot.slane %v442_v24, 3  ;;  %v479_v36 = vrot.slane %v443_v27, 2  ;;  %v481_v38 = vrot.slane %v444_v28, 1 }
 0x26d   :  { %448 = vst [vmem:[#allocation8 + $0x1b] sm:$0x1] %v440_v22  ;;  %v470_v29 = vsel %vm166_vm0, %v469_v25, %v437_v15 }
 0x26e   :  { %449 = vst [vmem:[#allocation8 + $0x23] sm:$0x1] %v441_v23  ;;  %v472_v31 = vsel %vm169_vm1, %v471_v26, %v470_v29 }
 0x26f   :  { %450 = vst [vmem:[#allocation8 + $0x2b] sm:$0x1] %v442_v24  ;;  %v474_v33 = vsel %vm172_vm2, %v473_v30, %v472_v31  ;;  %v552_v31 = vld [vmem:[#allocation3 + $0x5] sm:$0x1] }
 0x270   :  { %451 = vst [vmem:[#allocation8 + $0x33] sm:$0x1] %v443_v27  ;;  %v476_v35 = vsel %vm175_vm3, %v475_v32, %v474_v33  ;;  %v553_v32 = vld [vmem:[#allocation3 + $0xd] sm:$0x1]  ;;  %v554_v33 = vld [vmem:[#allocation3 + $0x15] sm:$0x1] }
 0x271   :  { %452 = vst [vmem:[#allocation8 + $0x3b] sm:$0x1] %v444_v28  ;;  %v478_v37 = vsel %vm178_vm4, %v477_v34, %v476_v35  ;;  %v555_v34 = vld [vmem:[#allocation3 + $0x1d] sm:$0x1] }
 0x272   :  { %v480_v39 = vsel %vm181_vm5, %v479_v36, %v478_v37  ;;  %v556_v36 = vld [vmem:[#allocation3 + $0x25] sm:$0x1]  ;;  %v557_v37 = vld [vmem:[#allocation3 + $0x2d] sm:$0x1] }
 0x273   :  { %v482_v40 = vsel %vm184_vm6, %v481_v38, %v480_v39  ;;  %v558_v38 = vld [vmem:[#allocation3 + $0x35] sm:$0x1] }
 0x274   :  { %500 = vmatmul.f32.vlgmr.msrb.gmra.mxu0 %v482_v40 }
 0x2f1   :  { %v501_v45 = vpop.f32.mrf.mxu0 }
 0x2f2   :  { %v505_v49 = vrot.slane %v501_v45, 1  ;;  %v506_v50 = vrot.slane %v501_v45, 2  ;;  %v507_v51 = vrot.slane %v501_v45, 3  ;;  %v508_v52 = vrot.slane %v501_v45, 4 }
 0x2f3   :  { %v509_v54 = vrot.slane %v501_v45, 5  ;;  %v520_v55 = vadd.f32 %v501_v45, %v453_v41  ;;  %v510_v56 = vrot.slane %v501_v45, 6  ;;  %v511_v57 = vrot.slane %v501_v45, 7 }
 0x2f4   :  { %v521_v58 = vadd.f32 %v505_v49, %v454_v42  ;;  %v522_v59 = vadd.f32 %v506_v50, %v455_v43  ;;  %v523_v60 = vadd.f32 %v507_v51, %v456_v44  ;;  %v524_v61 = vadd.f32 %v508_v52, %v457_v46  ;;  %v559_v43 = vld [vmem:[#allocation3 + $0x3d] sm:$0x1] }
 0x2f5   :  { %v528_v62 = vmax.f32 %v520_v55, 0.0  ;;  %v525_v63 = vadd.f32 %v509_v54, %v458_v47  ;;  %v526_v0 = vadd.f32 %v510_v56, %v459_v48  ;;  %v527_v1 = vadd.f32 %v511_v57, %v460_v53 }
 0x2f6   :  { %v529_v2 = vmax.f32 %v521_v58, 0.0  ;;  %v530_v3 = vmax.f32 %v522_v59, 0.0  ;;  %v531_v4 = vmax.f32 %v523_v60, 0.0  ;;  %v532_v5 = vmax.f32 %v524_v61, 0.0 }
 0x2f7   :  { %v536_v6 = vmin.f32 %v528_v62, 0.5  ;;  %v533_v7 = vmax.f32 %v525_v63, 0.0  ;;  %v534_v8 = vmax.f32 %v526_v0, 0.0  ;;  %v535_v11 = vmax.f32 %v527_v1, 0.0 }
 0x2f8   :  { %v537_v9 = vmin.f32 %v529_v2, 0.5  ;;  %v538_v10 = vmin.f32 %v530_v3, 0.5  ;;  %v539_v12 = vmin.f32 %v531_v4, 0.5  ;;  %v540_v13 = vmin.f32 %v532_v5, 0.5 }
 0x2f9   :  { %544 = vst [vmem:[#allocation8 + $0x4] sm:$0x1] %v536_v6  ;;  %v541_v14 = vmin.f32 %v533_v7, 0.5  ;;  %v542_v17 = vmin.f32 %v534_v8, 0.5  ;;  %v543_v18 = vmin.f32 %v535_v11, 0.5 }
 0x2fa   :  { %545 = vst [vmem:[#allocation8 + $0xc] sm:$0x1] %v537_v9  ;;  %v568_v15 = vrot.slane %v537_v9, 7  ;;  %v570_v16 = vrot.slane %v538_v10, 6  ;;  %v572_v20 = vrot.slane %v539_v12, 5  ;;  %v574_v22 = vrot.slane %v540_v13, 4 }
 0x2fb   :  { %546 = vst [vmem:[#allocation8 + $0x14] sm:$0x1] %v538_v10  ;;  %v576_v24 = vrot.slane %v541_v14, 3  ;;  %v578_v26 = vrot.slane %v542_v17, 2  ;;  %v580_v28 = vrot.slane %v543_v18, 1 }
 0x2fc   :  { %547 = vst [vmem:[#allocation8 + $0x1c] sm:$0x1] %v539_v12  ;;  %v569_v19 = vsel %vm166_vm0, %v568_v15, %v536_v6 }
 0x2fd   :  { %548 = vst [vmem:[#allocation8 + $0x24] sm:$0x1] %v540_v13  ;;  %v571_v21 = vsel %vm169_vm1, %v570_v16, %v569_v19 }
 0x2fe   :  { %549 = vst [vmem:[#allocation8 + $0x2c] sm:$0x1] %v541_v14  ;;  %v573_v23 = vsel %vm172_vm2, %v572_v20, %v571_v21  ;;  %v651_v21 = vld [vmem:[#allocation3 + $0x6] sm:$0x1] }
 0x2ff   :  { %550 = vst [vmem:[#allocation8 + $0x34] sm:$0x1] %v542_v17  ;;  %v575_v25 = vsel %vm175_vm3, %v574_v22, %v573_v23  ;;  %v652_v22 = vld [vmem:[#allocation3 + $0xe] sm:$0x1]  ;;  %v653_v23 = vld [vmem:[#allocation3 + $0x16] sm:$0x1] }
 0x300   :  { %551 = vst [vmem:[#allocation8 + $0x3c] sm:$0x1] %v543_v18  ;;  %v577_v27 = vsel %vm178_vm4, %v576_v24, %v575_v25  ;;  %v654_v24 = vld [vmem:[#allocation3 + $0x1e] sm:$0x1] }
 0x301   :  { %v579_v29 = vsel %vm181_vm5, %v578_v26, %v577_v27  ;;  %v655_v26 = vld [vmem:[#allocation3 + $0x26] sm:$0x1]  ;;  %v656_v27 = vld [vmem:[#allocation3 + $0x2e] sm:$0x1] }
 0x302   :  { %v581_v30 = vsel %vm184_vm6, %v580_v28, %v579_v29  ;;  %v657_v28 = vld [vmem:[#allocation3 + $0x36] sm:$0x1] }
 0x303   :  { %599 = vmatmul.f32.vlgmr.msrb.gmra.mxu1 %v581_v30 }
 0x380   :  { %v600_v35 = vpop.f32.mrf.mxu1 }
 0x381   :  { %v604_v39 = vrot.slane %v600_v35, 1  ;;  %v605_v40 = vrot.slane %v600_v35, 2  ;;  %v606_v41 = vrot.slane %v600_v35, 3  ;;  %v607_v42 = vrot.slane %v600_v35, 4 }
 0x382   :  { %v608_v44 = vrot.slane %v600_v35, 5  ;;  %v619_v45 = vadd.f32 %v600_v35, %v552_v31  ;;  %v609_v46 = vrot.slane %v600_v35, 6  ;;  %v610_v47 = vrot.slane %v600_v35, 7 }
 0x383   :  { %v620_v48 = vadd.f32 %v604_v39, %v553_v32  ;;  %v621_v49 = vadd.f32 %v605_v40, %v554_v33  ;;  %v622_v50 = vadd.f32 %v606_v41, %v555_v34  ;;  %v623_v51 = vadd.f32 %v607_v42, %v556_v36  ;;  %v658_v33 = vld [vmem:[#allocation3 + $0x3e] sm:$0x1] }
 0x384   :  { %v627_v52 = vmax.f32 %v619_v45, 0.0  ;;  %v624_v53 = vadd.f32 %v608_v44, %v557_v37  ;;  %v625_v54 = vadd.f32 %v609_v46, %v558_v38  ;;  %v626_v55 = vadd.f32 %v610_v47, %v559_v43 }
 0x385   :  { %v628_v56 = vmax.f32 %v620_v48, 0.0  ;;  %v629_v57 = vmax.f32 %v621_v49, 0.0  ;;  %v630_v58 = vmax.f32 %v622_v50, 0.0  ;;  %v631_v59 = vmax.f32 %v623_v51, 0.0 }
 0x386   :  { %v635_v60 = vmin.f32 %v627_v52, 0.5  ;;  %v632_v61 = vmax.f32 %v624_v53, 0.0  ;;  %v633_v62 = vmax.f32 %v625_v54, 0.0  ;;  %v634_v1 = vmax.f32 %v626_v55, 0.0 }
 0x387   :  { %v636_v63 = vmin.f32 %v628_v56, 0.5  ;;  %v637_v0 = vmin.f32 %v629_v57, 0.5  ;;  %v638_v2 = vmin.f32 %v630_v58, 0.5  ;;  %v639_v3 = vmin.f32 %v631_v59, 0.5 }
 0x388   :  { %643 = vst [vmem:[#allocation8 + $0x5] sm:$0x1] %v635_v60  ;;  %v640_v4 = vmin.f32 %v632_v61, 0.5  ;;  %v641_v7 = vmin.f32 %v633_v62, 0.5  ;;  %v642_v8 = vmin.f32 %v634_v1, 0.5 }
 0x389   :  { %644 = vst [vmem:[#allocation8 + $0xd] sm:$0x1] %v636_v63  ;;  %v667_v5 = vrot.slane %v636_v63, 7  ;;  %v669_v6 = vrot.slane %v637_v0, 6  ;;  %v671_v10 = vrot.slane %v638_v2, 5  ;;  %v673_v12 = vrot.slane %v639_v3, 4 }
 0x38a   :  { %645 = vst [vmem:[#allocation8 + $0x15] sm:$0x1] %v637_v0  ;;  %v675_v14 = vrot.slane %v640_v4, 3  ;;  %v677_v16 = vrot.slane %v641_v7, 2  ;;  %v679_v18 = vrot.slane %v642_v8, 1 }
 0x38b   :  { %646 = vst [vmem:[#allocation8 + $0x1d] sm:$0x1] %v638_v2  ;;  %v668_v9 = vsel %vm166_vm0, %v667_v5, %v635_v60 }
 0x38c   :  { %647 = vst [vmem:[#allocation8 + $0x25] sm:$0x1] %v639_v3  ;;  %v670_v11 = vsel %vm169_vm1, %v669_v6, %v668_v9 }
 0x38d   :  { %648 = vst [vmem:[#allocation8 + $0x2d] sm:$0x1] %v640_v4  ;;  %v672_v13 = vsel %vm172_vm2, %v671_v10, %v670_v11  ;;  %v750_v11 = vld [vmem:[#allocation3 + $0x7] sm:$0x1] }
 0x38e   :  { %649 = vst [vmem:[#allocation8 + $0x35] sm:$0x1] %v641_v7  ;;  %v674_v15 = vsel %vm175_vm3, %v673_v12, %v672_v13  ;;  %v751_v12 = vld [vmem:[#allocation3 + $0xf] sm:$0x1]  ;;  %v752_v13 = vld [vmem:[#allocation3 + $0x17] sm:$0x1] }
 0x38f   :  { %650 = vst [vmem:[#allocation8 + $0x3d] sm:$0x1] %v642_v8  ;;  %v676_v17 = vsel %vm178_vm4, %v675_v14, %v674_v15  ;;  %v753_v14 = vld [vmem:[#allocation3 + $0x1f] sm:$0x1]  ;;  %v754_v15 = vld [vmem:[#allocation3 + $0x27] sm:$0x1] }
 0x390   :  { %v678_v19 = vsel %vm181_vm5, %v677_v16, %v676_v17  ;;  %v755_v16 = vld [vmem:[#allocation3 + $0x2f] sm:$0x1]  ;;  %v756_v17 = vld [vmem:[#allocation3 + $0x37] sm:$0x1] }
 0x391   :  { %v680_v20 = vsel %vm184_vm6, %v679_v18, %v678_v19  ;;  %v757_v19 = vld [vmem:[#allocation3 + $0x3f] sm:$0x1] }
 0x392   :  { %698 = vmatmul.f32.vlgmr.msrb.gmra.mxu2 %v680_v20 }
 0x415   :  { %v699_v25 = vpop.f32.mrf.mxu2 }
 0x416   :  { %v703_v29 = vrot.slane %v699_v25, 1  ;;  %v704_v30 = vrot.slane %v699_v25, 2  ;;  %v705_v31 = vrot.slane %v699_v25, 3  ;;  %v706_v32 = vrot.slane %v699_v25, 4 }
 0x417   :  { %v707_v34 = vrot.slane %v699_v25, 5  ;;  %v718_v35 = vadd.f32 %v699_v25, %v651_v21  ;;  %v708_v36 = vrot.slane %v699_v25, 6  ;;  %v709_v37 = vrot.slane %v699_v25, 7 }
 0x418   :  { %v719_v38 = vadd.f32 %v703_v29, %v652_v22  ;;  %v720_v39 = vadd.f32 %v704_v30, %v653_v23  ;;  %v721_v40 = vadd.f32 %v705_v31, %v654_v24  ;;  %v722_v41 = vadd.f32 %v706_v32, %v655_v26 }
 0x419   :  { %v726_v42 = vmax.f32 %v718_v35, 0.0  ;;  %v723_v43 = vadd.f32 %v707_v34, %v656_v27  ;;  %v724_v44 = vadd.f32 %v708_v36, %v657_v28  ;;  %v725_v45 = vadd.f32 %v709_v37, %v658_v33 }
 0x41a   :  { %v727_v46 = vmax.f32 %v719_v38, 0.0  ;;  %v728_v47 = vmax.f32 %v720_v39, 0.0  ;;  %v729_v48 = vmax.f32 %v721_v40, 0.0  ;;  %v730_v49 = vmax.f32 %v722_v41, 0.0 }
 0x41b   :  { %v734_v50 = vmin.f32 %v726_v42, 0.5  ;;  %v731_v51 = vmax.f32 %v723_v43, 0.0  ;;  %v732_v52 = vmax.f32 %v724_v44, 0.0  ;;  %v733_v55 = vmax.f32 %v725_v45, 0.0 }
 0x41c   :  { %v735_v53 = vmin.f32 %v727_v46, 0.5  ;;  %v736_v54 = vmin.f32 %v728_v47, 0.5  ;;  %v737_v56 = vmin.f32 %v729_v48, 0.5  ;;  %v738_v57 = vmin.f32 %v730_v49, 0.5 }
 0x41d   :  { %742 = vst [vmem:[#allocation8 + $0x6] sm:$0x1] %v734_v50  ;;  %v739_v58 = vmin.f32 %v731_v51, 0.5  ;;  %v740_v61 = vmin.f32 %v732_v52, 0.5  ;;  %v741_v62 = vmin.f32 %v733_v55, 0.5 }
 0x41e   :  { %743 = vst [vmem:[#allocation8 + $0xe] sm:$0x1] %v735_v53  ;;  %v766_v59 = vrot.slane %v735_v53, 7  ;;  %v768_v60 = vrot.slane %v736_v54, 6  ;;  %v770_v0 = vrot.slane %v737_v56, 5  ;;  %v772_v2 = vrot.slane %v738_v57, 4 }
 0x41f   :  { %744 = vst [vmem:[#allocation8 + $0x16] sm:$0x1] %v736_v54  ;;  %v774_v4 = vrot.slane %v739_v58, 3  ;;  %v776_v6 = vrot.slane %v740_v61, 2  ;;  %v778_v8 = vrot.slane %v741_v62, 1 }
 0x420   :  { %745 = vst [vmem:[#allocation8 + $0x1e] sm:$0x1] %v737_v56  ;;  %v767_v63 = vsel %vm166_vm0, %v766_v59, %v734_v50 }
 0x421   :  { %746 = vst [vmem:[#allocation8 + $0x26] sm:$0x1] %v738_v57  ;;  %v769_v1 = vsel %vm169_vm1, %v768_v60, %v767_v63 }
 0x422   :  { %747 = vst [vmem:[#allocation8 + $0x2e] sm:$0x1] %v739_v58  ;;  %v771_v3 = vsel %vm172_vm2, %v770_v0, %v769_v1 }
 0x423   :  { %748 = vst [vmem:[#allocation8 + $0x36] sm:$0x1] %v740_v61  ;;  %v773_v5 = vsel %vm175_vm3, %v772_v2, %v771_v3 }
 0x424   :  { %749 = vst [vmem:[#allocation8 + $0x3e] sm:$0x1] %v741_v62  ;;  %v775_v7 = vsel %vm178_vm4, %v774_v4, %v773_v5 }
 0x425   :  { %v777_v9 = vsel %vm181_vm5, %v776_v6, %v775_v7 }
 0x426   :  { %v779_v10 = vsel %vm184_vm6, %v778_v8, %v777_v9 }
 0x427   :  { %797 = vmatmul.f32.vlgmr.msrb.gmra.mxu3 %v779_v10 }
 0x4aa   :  { %v798_v18 = vpop.f32.mrf.mxu3 }
 0x4ab   :  { %v802_v20 = vrot.slane %v798_v18, 1  ;;  %v803_v21 = vrot.slane %v798_v18, 2  ;;  %v804_v22 = vrot.slane %v798_v18, 3  ;;  %v805_v23 = vrot.slane %v798_v18, 4 }
 0x4ac   :  { %v806_v24 = vrot.slane %v798_v18, 5  ;;  %v807_v25 = vrot.slane %v798_v18, 6  ;;  %v808_v26 = vrot.slane %v798_v18, 7  ;;  %v817_v27 = vadd.f32 %v798_v18, %v750_v11 }
 0x4ad   :  { %v818_v28 = vadd.f32 %v802_v20, %v751_v12  ;;  %v819_v29 = vadd.f32 %v803_v21, %v752_v13  ;;  %v820_v30 = vadd.f32 %v804_v22, %v753_v14  ;;  %v821_v31 = vadd.f32 %v805_v23, %v754_v15 }
 0x4ae   :  { %v822_v32 = vadd.f32 %v806_v24, %v755_v16  ;;  %v823_v33 = vadd.f32 %v807_v25, %v756_v17  ;;  %v824_v34 = vadd.f32 %v808_v26, %v757_v19  ;;  %v825_v35 = vmax.f32 %v817_v27, 0.0 }
 0x4af   :  { %v826_v36 = vmax.f32 %v818_v28, 0.0  ;;  %v827_v37 = vmax.f32 %v819_v29, 0.0  ;;  %v828_v38 = vmax.f32 %v820_v30, 0.0  ;;  %v829_v39 = vmax.f32 %v821_v31, 0.0 }
 0x4b0   :  { %v830_v40 = vmax.f32 %v822_v32, 0.0  ;;  %v831_v41 = vmax.f32 %v823_v33, 0.0  ;;  %v833_v42 = vmin.f32 %v825_v35, 0.5  ;;  %v832_v43 = vmax.f32 %v824_v34, 0.0 }
 0x4b1   :  { %v834_v44 = vmin.f32 %v826_v36, 0.5  ;;  %v835_v45 = vmin.f32 %v827_v37, 0.5  ;;  %v836_v46 = vmin.f32 %v828_v38, 0.5  ;;  %v837_v47 = vmin.f32 %v829_v39, 0.5 }
 0x4b2   :  { %841 = vst [vmem:[#allocation8 + $0x7] sm:$0x1] %v833_v42  ;;  %v838_v48 = vmin.f32 %v830_v40, 0.5  ;;  %v839_v49 = vmin.f32 %v831_v41, 0.5  ;;  %v840_v50 = vmin.f32 %v832_v43, 0.5 }
 0x4b3   :  { %842 = vst [vmem:[#allocation8 + $0xf] sm:$0x1] %v834_v44 }
 0x4b4   :  { %843 = vst [vmem:[#allocation8 + $0x17] sm:$0x1] %v835_v45 }
 0x4b5   :  { %844 = vst [vmem:[#allocation8 + $0x1f] sm:$0x1] %v836_v46 }
 0x4b6   :  { %845 = vst [vmem:[#allocation8 + $0x27] sm:$0x1] %v837_v47 }
 0x4b7   :  { %846 = vst [vmem:[#allocation8 + $0x2f] sm:$0x1] %v838_v48 }
 0x4b8   :  { %847 = vst [vmem:[#allocation8 + $0x37] sm:$0x1] %v839_v49 }
 0x4b9   :  { %848 = vst [vmem:[#allocation8 + $0x3f] sm:$0x1] %v840_v50 }
 0x4ba   :  { %885 = dma.vmem_to_hbm [thread:$0]  %s878_s24, 1024, %s880_s27, [#allocation5], %s978_s20, %s978_s20, %s979_s21  }
 0x4bb   :  { %975 = dma.done.wait [#allocation5], 1024  }
 0x4bc   :  { %976 = vsyncadd [#allocation5], 4294966272 }
 0x4bd   :  { %890 = vsyncpa [#allocation4], 1 }
 0x4be   :  { %891 = vsyncpa [#allocation7], 1 }
 0x4bf   :  { %892 = vsyncpa [#allocation5], 1 }

</bundles_post_ra>
